<compile_context>
chip_gen: v7x
topology: tpu7x:2x2x1
jax: 0.10.0
libtpu: 0.0.40
codegen_flags: <defaults>
</compile_context>

<pallas_src>
import functools

import jax
import jax.numpy as jnp
from jax.experimental import pallas as pl
from jax.experimental.pallas import tpu as pltpu

VMEM = pltpu.MemorySpace.VMEM
LANES = 128


def _softplus(x):
    # Numerically-stable softplus; same formulation in kernel and reference.
    return jnp.maximum(x, 0.0) + jnp.log(1.0 + jnp.exp(-jnp.abs(x)))


# --------------------- fused PNN forward (+ loss) kernel -------------------- #

def _fused_pnn_kernel(*refs, meta, with_loss, has_reg, reg_lambda, batch_real):
    """Whole PNN forward (all layers, all columns, head) + optional MSE loss.

    Ref order: x, a, param_slab, [y, [l1_slab]], out, [loss].
    Gridless: every block is the full array resident in VMEM.
    """
    offs = meta["offsets"]
    h_dims = meta["h_dims"]
    n_cols = meta["n_cols"]
    out_dim = meta["out_dim"]
    out_var = meta["out_var"]
    x_dim = meta["x_dim"]
    a_dim = meta["a_dim"]
    out_feat = 2 * out_dim if out_var else out_dim

    x_ref, a_ref, p_ref = refs[0], refs[1], refs[2]
    idx = 3
    y_ref = l1_ref = loss_ref = None
    if with_loss:
        y_ref = refs[idx]; idx += 1
        if has_reg:
            l1_ref = refs[idx]; idx += 1
    o_ref = refs[idx]; idx += 1
    if with_loss:
        loss_ref = refs[idx]

    def dot(a, b):
        return jnp.dot(a, b, preferred_element_type=jnp.float32)

    def wblock(name):                       # (128, 128) static weight view
        o = offs[name]
        return p_ref[o:o + LANES, :]

    def brow(name):                         # (1, 128) static bias/logvar view
        o = offs[name]
        return p_ref[o:o + 1, :]

    # ---- layer 0: one wide matmul over all columns; concat(x, a) is folded
    # into a row split of W0 (x-part / a-part) -> no runtime concatenate.
    w0x = p_ref[offs["w0x"]:offs["w0x"] + x_dim, :]
    w0a = p_ref[offs["w0a"]:offs["w0a"] + a_dim, :]
    h = dot(x_ref[...], w0x) + dot(a_ref[...], w0a) + brow("b0")
    h = jnp.maximum(h, 0.0)                 # (B, 128); lanes >= n_cols*h0 stay 0

    # ---- layers 1..L-1: block-diagonal W across columns; laterals as ONE
    # V matmul (alpha pre-folded) + relu + ONE U matmul into off-diag lanes.
    for i in range(1, len(h_dims)):
        z = dot(h, wblock(f"W{i}")) + brow(f"b{i}")      # bU already folded in
        if n_cols > 1:
            lat = jnp.maximum(dot(h, wblock(f"V{i}")) + brow(f"bV{i}"), 0.0)
            z = z + dot(lat, wblock(f"U{i}"))
        h = jnp.maximum(z, 0.0)

    # ---- head of the active column (selected by zero rows in Wh -> no lane
    # extract of h); mean|logvar land in disjoint lanes of one (B,128) tile.
    yh = dot(h, wblock("Wh")) + brow("bh")
    if out_var:
        mx, mn = brow("maxlv"), brow("minlv")
        clamped = mx - _softplus(mx - yh)
        clamped = mn + _softplus(clamped - mn)
        lane = jax.lax.broadcasted_iota(jnp.int32, yh.shape, 1)
        yh = jnp.where(lane >= out_dim, clamped, yh)     # single lane select
    pred = yh[:, :out_feat]
    o_ref[...] = pred.astype(o_ref.dtype)                # ONE store

    # ---- fused MSE loss: -sum((pred - y)^2)/y_dim - reg_lambda * L1(params)
    if with_loss:
        d = pred - y_ref[...]
        if batch_real < d.shape[0]:                      # mask padded rows
            rows = jax.lax.broadcasted_iota(jnp.int32, d.shape, 0)
            d = jnp.where(rows < batch_real, d, 0.0)
        sse = jnp.sum(d * d, axis=1, keepdims=True)      # lane reduce
        sse = jnp.sum(sse, axis=0, keepdims=True)        # sublane reduce (1,1)
        loss = -(sse / float(out_feat))
        if has_reg:
            l1 = jnp.sum(jnp.abs(l1_ref[...]), axis=1, keepdims=True)
            l1 = jnp.sum(l1, axis=0, keepdims=True)
            loss = loss - reg_lambda * l1
        loss_ref[...] = loss


# --------------------------------- wrappers --------------------------------- #

def _pad_rows(arr, b_pad):
    b = arr.shape[0]
    if b == b_pad:
        return arr
    return jnp.concatenate(
        [arr, jnp.zeros((b_pad - b,) + arr.shape[1:], arr.dtype)], axis=0)


def _out_feat(meta):
    return 2 * meta["out_dim"] if meta["out_var"] else meta["out_dim"]


def pnn_forward_fused(packed, meta, x, a):
    """PNN forward only (single pallas_call)."""
    B = x.shape[0]
    Bp = max(8, ((B + 7) // 8) * 8)         # f32 sublane tile = 8 rows
    x = _pad_rows(x.astype(jnp.float32), Bp)
    a = _pad_rows(a.astype(jnp.float32), Bp)
    kernel = functools.partial(_fused_pnn_kernel, meta=meta, with_loss=False,
                               has_reg=False, reg_lambda=0.0, batch_real=B)
    pred = pl.pallas_call(
        kernel,
        out_shape=jax.ShapeDtypeStruct((Bp, _out_feat(meta)), jnp.float32),
        in_specs=[pl.BlockSpec(memory_space=VMEM)] * 3,
        out_specs=pl.BlockSpec(memory_space=VMEM),
    )(x, a, packed)
    return pred[:B]


def pnn_forward_and_loss_fused(packed, meta, x, a, y, *, reg_lambda=0.0,
                               l1_packed=None):
    """PNN forward + MSELoss.forward (task_id-given / M==0 path) in ONE call.

    Returns (pred, loss) with loss = -sum((pred-y)^2)/y_dim - reg_lambda*L1.
    """
    # TODO(synk): the M>0 replay branch needs self.model.replay(i) buffers,
    # which do not exist in this standalone script; only the task_id-given /
    # M==0 path is implemented.
    B = x.shape[0]
    out_feat = _out_feat(meta)
    assert y.shape[-1] == out_feat, (y.shape, out_feat)
    Bp = max(8, ((B + 7) // 8) * 8)
    x = _pad_rows(x.astype(jnp.float32), Bp)
    a = _pad_rows(a.astype(jnp.float32), Bp)
    y = _pad_rows(y.astype(jnp.float32), Bp)
    has_reg = (reg_lambda != 0.0) and (l1_packed is not None)
    inputs = [x, a, packed, y] + ([l1_packed] if has_reg else [])
    kernel = functools.partial(_fused_pnn_kernel, meta=meta, with_loss=True,
                               has_reg=has_reg, reg_lambda=float(reg_lambda),
                               batch_real=B)
    pred, loss = pl.pallas_call(
        kernel,
        out_shape=(jax.ShapeDtypeStruct((Bp, out_feat), jnp.float32),
                   jax.ShapeDtypeStruct((1, 1), jnp.float32)),
        in_specs=[pl.BlockSpec(memory_space=VMEM)] * len(inputs),
        out_specs=(pl.BlockSpec(memory_space=VMEM),
                   pl.BlockSpec(memory_space=VMEM)),
    )(*inputs)
    return pred[:B], loss[0, 0]


# ------------------------------ parameter setup ----------------------------- #

def _init_linear(key, n_in, n_out):
    # PyTorch nn.Linear default: U(-1/sqrt(fan_in), 1/sqrt(fan_in))
    k1, k2 = jax.random.split(key)
    bound = 1.0 / float(n_in) ** 0.5
    W = jax.random.uniform(k1, (n_out, n_in), jnp.float32, -bound, bound)
    b = jax.random.uniform(k2, (n_out,), jnp.float32, -bound, bound)
    return W, b


def build_pnn_params(key, x_dim, a_dim, out_dim, h_dims, num_tasks, out_var=True):
    """Mirrors PNN.add_weights(task_id) for task_id = 0..num_tasks-1 (torch layout)."""
    columns, max_logvars, min_logvars = [], [], []
    for task_id in range(num_tasks):
        col = []
        n_in = x_dim + a_dim
        for i, n_out in enumerate(h_dims):
            key, kW, kV, ka, kU = jax.random.split(key, 5)
            blk = {}
            blk["W"], blk["bW"] = _init_linear(kW, n_in, n_out)
            if i > 0 and task_id > 0:
                blk["V"], blk["bV"] = _init_linear(kV, n_in * task_id, n_out)
                blk["alpha"] = jax.random.normal(ka, (n_in * task_id,), jnp.float32) * 0.01
                blk["U"], blk["bU"] = _init_linear(kU, n_out, n_out)
            col.append(blk)
            n_in = n_out
        key, k1, k2 = jax.random.split(key, 3)
        head = {}
        head["W1"], head["b1"] = _init_linear(k1, n_in, out_dim)
        if out_var:
            head["W2"], head["b2"] = _init_linear(k2, n_in, out_dim)
            max_logvars.append(jnp.ones((1, out_dim), jnp.float32) / 2.0)
            min_logvars.append(-jnp.ones((1, out_dim), jnp.float32) * 10.0)
        columns.append({"blocks": col, "head": head})
    return {"columns": columns, "max_logvar": max_logvars, "min_logvar": min_logvars,
            "h_dims": list(h_dims), "out_var": out_var, "x_dim": x_dim, "a_dim": a_dim}


def prepare_fused_params(params, task_id=None):
    """ONE-TIME re-layout of torch-convention params into ONE (R,128) VMEM slab.

    Every tensor sits at an 8-row-aligned static row offset (recorded in meta);
    weights are zero-padded to full 128x128 blocks so the kernel's activations
    stay 128 lanes wide end-to-end (no lane slicing, no runtime concat).
    """
    n_total = len(params["columns"])
    task_id = n_total - 1 if task_id is None else task_id
    n_cols = task_id + 1
    cols = params["columns"][:n_cols]
    h_dims = list(params["h_dims"])
    x_dim, a_dim = params["x_dim"], params["a_dim"]
    out_var = params["out_var"]
    out_dim = cols[task_id]["head"]["W1"].shape[0]
    out_feat = 2 * out_dim if out_var else out_dim

    assert n_cols * max(h_dims) <= LANES, "column-concatenated width must fit 128 lanes"
    assert out_feat <= LANES and x_dim <= LANES and a_dim <= LANES

    blocks, offsets = [], {}
    cur = 0

    def add(name, mat, rows_pad):
        nonlocal cur
        mat = jnp.asarray(mat, jnp.float32)
        r, c = mat.shape
        blk = jnp.zeros((rows_pad, LANES), jnp.float32).at[:r, :c].set(mat)
        offsets[name] = cur
        blocks.append(blk)
        cur += rows_pad

    # layer 0: all columns lane-concatenated; split by x / a rows.
    W0 = jnp.concatenate([c["blocks"][0]["W"].T for c in cols], axis=1)
    b0 = jnp.concatenate([c["blocks"][0]["bW"] for c in cols], axis=0)[None, :]
    add("w0x", W0[:x_dim], 8)
    add("w0a", W0[x_dim:], 8)
    add("b0", b0, 8)

    # layers 1..L-1: block-diagonal W; laterals packed into V (alpha folded)
    # and U (bU folded into the layer bias) blocks.
    for i in range(1, len(h_dims)):
        hp, hh = h_dims[i - 1], h_dims[i]
        Wb = jnp.zeros((LANES, LANES), jnp.float32)
        bb = jnp.zeros((1, LANES), jnp.float32)
        Vb = jnp.zeros((LANES, LANES), jnp.float32)
        bVb = jnp.zeros((1, LANES), jnp.float32)
        Ub = jnp.zeros((LANES, LANES), jnp.float32)
        for j in range(n_cols):
            blk = cols[j]["blocks"][i]
            Wb = Wb.at[j * hp:(j + 1) * hp, j * hh:(j + 1) * hh].set(blk["W"].T)
            bias = blk["bW"]
            if j > 0:
                bias = bias + blk["bU"]                       # bU folded (post-relu)
                Vb = Vb.at[:j * hp, (j - 1) * hh:j * hh].set(
                    blk["alpha"][:, None] * blk["V"].T)       # alpha folded into V
                bVb = bVb.at[0, (j - 1) * hh:j * hh].set(blk["bV"])
                Ub = Ub.at[(j - 1) * hh:j * hh, j * hh:(j + 1) * hh].set(blk["U"].T)
            bb = bb.at[0, j * hh:(j + 1) * hh].set(bias)
        add(f"W{i}", Wb, LANES)
        add(f"b{i}", bb, 8)
        if n_cols > 1:
            add(f"V{i}", Vb, LANES)
            add(f"bV{i}", bVb, 8)
            add(f"U{i}", Ub, LANES)

    # head of the active column, selected purely via zero rows (no lane slice).
    head = cols[task_id]["head"]
    h_last = h_dims[-1]
    r0 = task_id * h_last
    Wh = jnp.zeros((LANES, LANES), jnp.float32)
    Wh = Wh.at[r0:r0 + h_last, 0:out_dim].set(head["W1"].T)
    bh = jnp.zeros((1, LANES), jnp.float32).at[0, 0:out_dim].set(head["b1"])
    if out_var:
        Wh = Wh.at[r0:r0 + h_last, out_dim:2 * out_dim].set(head["W2"].T)
        bh = bh.at[0, out_dim:2 * out_dim].set(head["b2"])
    add("Wh", Wh, LANES)
    add("bh", bh, 8)
    if out_var:
        mx = jnp.zeros((1, LANES), jnp.float32).at[0, out_dim:2 * out_dim].set(
            params["max_logvar"][task_id][0])
        mn = jnp.zeros((1, LANES), jnp.float32).at[0, out_dim:2 * out_dim].set(
            params["min_logvar"][task_id][0])
        add("maxlv", mx, 8)
        add("minlv", mn, 8)

    packed = jnp.concatenate(blocks, axis=0)
    meta = dict(offsets=offsets, n_cols=n_cols, h_dims=tuple(h_dims),
                out_dim=out_dim, out_var=out_var, x_dim=x_dim, a_dim=a_dim)
    return packed, meta


def pack_l1_params(params):
    """Packed copy of the ORIGINAL parameters (all columns, max/min_logvar
    excluded) as an (R, 128) slab for a single in-kernel abs-sum reduction.
    Must NOT be built from the fused slab: alpha is folded into V there."""
    leaves = []
    for col in params["columns"]:
        for blk in col["blocks"]:
            for k in sorted(blk):
                leaves.append(jnp.ravel(blk[k]))
        for k in sorted(col["head"]):
            leaves.append(jnp.ravel(col["head"][k]))
    flat = jnp.concatenate(leaves).astype(jnp.float32)
    n = flat.shape[0]
    rows = max(8, (((n + LANES - 1) // LANES + 7) // 8) * 8)
    buf = jnp.zeros((rows * LANES,), jnp.float32).at[:n].set(flat)
    return buf.reshape(rows, LANES)


# ------------------------- pure-JAX references (check) ----------------------- #

def pnn_forward_ref(params, x, a, task_id=None):
    num_tasks = len(params["columns"])
    if task_id is None:
        task_id = num_tasks - 1
    h = [jnp.concatenate([x, a], axis=-1)]
    for i in range(len(params["h_dims"])):
        o = []
        for j in range(task_id + 1):
            blk = params["columns"][j]["blocks"][i]
            src = h[0] if i == 0 else h[j]
            xout = src @ blk["W"].T + blk["bW"]
            if i > 0 and j > 0:
                a_cat = jnp.concatenate(h[:j], axis=1)
                lat = (blk["alpha"] * a_cat) @ blk["V"].T + blk["bV"]
                lat = jnp.maximum(lat, 0.0)
                lat = lat @ blk["U"].T + blk["bU"]
                xout = xout + lat
            o.append(jnp.maximum(xout, 0.0))
        h = o
    hT = h[task_id]
    head = params["columns"][task_id]["head"]
    mean = hT @ head["W1"].T + head["b1"]
    logvar = hT @ head["W2"].T + head["b2"]
    maxlv = params["max_logvar"][task_id]
    minlv = params["min_logvar"][task_id]
    logvar = maxlv - _softplus(maxlv - logvar)
    logvar = minlv + _softplus(logvar - minlv)
    return jnp.concatenate([mean, logvar], axis=-1)


def _l1_reg_ref(params):
    total = jnp.float32(0.0)
    for col in params["columns"]:
        for blk in col["blocks"]:
            for v in blk.values():
                total = total + jnp.sum(jnp.abs(v))
        for v in col["head"].values():
            total = total + jnp.sum(jnp.abs(v))
    return total


def mse_loss_ref(params, pred, y, *, reg_lambda=0.0):
    y_dim = y.shape[-1]
    loss = jnp.sum((pred - y) ** 2) / float(y_dim)
    reg = 0.0 if reg_lambda == 0.0 else reg_lambda * _l1_reg_ref(params)
    return -loss - reg


# ----------------------------------- main ------------------------------------ #

if __name__ == "__main__":
    # hparams: state_dim=6, control_dim=2, out_dim=6, hidden_layers=[32, 32],
    # out_var=True; two tasks so lateral connections are exercised.
    state_dim, control_dim, out_dim = 6, 2, 6
    h_dims = [32, 32]
    num_tasks = 2
    batch = 8                      # multiple of 8: full f32 sublane tiles
    reg_lambda = 0.01

    key = jax.random.PRNGKey(0)
    key, kp, kx, ka, ky = jax.random.split(key, 5)
    params = build_pnn_params(kp, state_dim, control_dim, out_dim, h_dims,
                              num_tasks, out_var=True)

    # one-time re-layouts (NOT in the hot path)
    packed, meta = prepare_fused_params(params)       # latest task (task_id=1)
    l1_packed = pack_l1_params(params)

    x = jax.random.normal(kx, (batch, state_dim), jnp.float32)
    a = jax.random.normal(ka, (batch, control_dim), jnp.float32)
    y = jax.random.normal(ky, (batch, 2 * out_dim), jnp.float32)

    # fused PNN forward + MSELoss.forward in ONE pallas_call
    pred, loss = pnn_forward_and_loss_fused(packed, meta, x, a, y,
                                            reg_lambda=reg_lambda,
                                            l1_packed=l1_packed)
    pred = jax.block_until_ready(pred)
    loss = jax.block_until_ready(loss)

    # forward-only path (shares the same kernel body)
    pred_only = jax.block_until_ready(pnn_forward_fused(packed, meta, x, a))

    # pure-JAX references
    pred_ref = jax.block_until_ready(pnn_forward_ref(params, x, a, task_id=None))
    loss_ref = jax.block_until_ready(
        mse_loss_ref(params, pred_ref, y, reg_lambda=reg_lambda))

    assert pred.shape == (batch, 2 * out_dim), pred.shape
    assert jnp.allclose(pred, pred_ref, atol=1e-4, rtol=1e-4), (pred, pred_ref)
    assert jnp.allclose(pred_only, pred, atol=1e-5, rtol=1e-5)
    assert jnp.allclose(loss, loss_ref, atol=1e-3, rtol=1e-3), (loss, loss_ref)

    print("KERNEL_OK")
</pallas_src>

<mosaic_0001>
module attributes {stable_mosaic.version = 11 : i64} {
  func.func @_fused_pnn_kernel(%arg0: memref<8x6xf32, #tpu.memory_space<vmem>>, %arg1: memref<8x2xf32, #tpu.memory_space<vmem>>, %arg2: memref<576x128xf32, #tpu.memory_space<vmem>>, %arg3: memref<8x12xf32, #tpu.memory_space<vmem>>, %arg4: memref<48x128xf32, #tpu.memory_space<vmem>>, %arg5: memref<8x12xf32, #tpu.memory_space<vmem>>, %arg6: memref<1x1xf32, #tpu.memory_space<vmem>>) attributes {dimension_semantics = [], scalar_prefetch = 0 : i64, scratch_operands = 0 : i64, tpu.core_type = #tpu.core_type<tc>} {
    %c0 = arith.constant 0 : index
    %c0_0 = arith.constant 0 : index
    %0 = vector.load %arg2[%c0, %c0_0] : memref<576x128xf32, #tpu.memory_space<vmem>>, vector<6x128xf32>
    %c8 = arith.constant 8 : index
    %c0_1 = arith.constant 0 : index
    %1 = vector.load %arg2[%c8, %c0_1] : memref<576x128xf32, #tpu.memory_space<vmem>>, vector<2x128xf32>
    %c0_2 = arith.constant 0 : index
    %c0_3 = arith.constant 0 : index
    %2 = vector.load %arg0[%c0_2, %c0_3] : memref<8x6xf32, #tpu.memory_space<vmem>>, vector<8x6xf32>
    %cst = arith.constant dense<0.000000e+00> : vector<8x128xf32>
    %3 = tpu.matmul %2, %0, %cst {dimension_numbers = #tpu.dot_dimension_numbers<[1], [0], [0], [1], [0, 0, 1, 1], [], []>} : vector<8x6xf32>, vector<6x128xf32>, vector<8x128xf32> -> vector<8x128xf32>
    %c0_4 = arith.constant 0 : index
    %c0_5 = arith.constant 0 : index
    %4 = vector.load %arg1[%c0_4, %c0_5] : memref<8x2xf32, #tpu.memory_space<vmem>>, vector<8x2xf32>
    %cst_6 = arith.constant dense<0.000000e+00> : vector<8x128xf32>
    %5 = tpu.matmul %4, %1, %cst_6 {dimension_numbers = #tpu.dot_dimension_numbers<[1], [0], [0], [1], [0, 0, 1, 1], [], []>} : vector<8x2xf32>, vector<2x128xf32>, vector<8x128xf32> -> vector<8x128xf32>
    %6 = arith.addf %3, %5 : vector<8x128xf32>
    %c16 = arith.constant 16 : index
    %c0_7 = arith.constant 0 : index
    %7 = vector.load %arg2[%c16, %c0_7] : memref<576x128xf32, #tpu.memory_space<vmem>>, vector<1x128xf32>
    %8 = vector.broadcast %7 : vector<1x128xf32> to vector<8x128xf32>
    %9 = arith.addf %6, %8 : vector<8x128xf32>
    %cst_8 = arith.constant 0.000000e+00 : f32
    %10 = vector.broadcast %cst_8 : f32 to vector<8x128xf32>
    %11 = arith.maximumf %9, %10 : vector<8x128xf32>
    %c24 = arith.constant 24 : index
    %c0_9 = arith.constant 0 : index
    %12 = vector.load %arg2[%c24, %c0_9] : memref<576x128xf32, #tpu.memory_space<vmem>>, vector<128x128xf32>
    %cst_10 = arith.constant dense<0.000000e+00> : vector<8x128xf32>
    %13 = tpu.matmul %11, %12, %cst_10 {dimension_numbers = #tpu.dot_dimension_numbers<[1], [0], [0], [1], [0, 0, 1, 1], [], []>} : vector<8x128xf32>, vector<128x128xf32>, vector<8x128xf32> -> vector<8x128xf32>
    %c152 = arith.constant 152 : index
    %c0_11 = arith.constant 0 : index
    %14 = vector.load %arg2[%c152, %c0_11] : memref<576x128xf32, #tpu.memory_space<vmem>>, vector<1x128xf32>
    %15 = vector.broadcast %14 : vector<1x128xf32> to vector<8x128xf32>
    %16 = arith.addf %13, %15 : vector<8x128xf32>
    %c160 = arith.constant 160 : index
    %c0_12 = arith.constant 0 : index
    %17 = vector.load %arg2[%c160, %c0_12] : memref<576x128xf32, #tpu.memory_space<vmem>>, vector<128x128xf32>
    %cst_13 = arith.constant dense<0.000000e+00> : vector<8x128xf32>
    %18 = tpu.matmul %11, %17, %cst_13 {dimension_numbers = #tpu.dot_dimension_numbers<[1], [0], [0], [1], [0, 0, 1, 1], [], []>} : vector<8x128xf32>, vector<128x128xf32>, vector<8x128xf32> -> vector<8x128xf32>
    %c288 = arith.constant 288 : index
    %c0_14 = arith.constant 0 : index
    %19 = vector.load %arg2[%c288, %c0_14] : memref<576x128xf32, #tpu.memory_space<vmem>>, vector<1x128xf32>
    %20 = vector.broadcast %19 : vector<1x128xf32> to vector<8x128xf32>
    %21 = arith.addf %18, %20 : vector<8x128xf32>
    %cst_15 = arith.constant 0.000000e+00 : f32
    %22 = vector.broadcast %cst_15 : f32 to vector<8x128xf32>
    %23 = arith.maximumf %21, %22 : vector<8x128xf32>
    %c296 = arith.constant 296 : index
    %c0_16 = arith.constant 0 : index
    %24 = vector.load %arg2[%c296, %c0_16] : memref<576x128xf32, #tpu.memory_space<vmem>>, vector<128x128xf32>
    %cst_17 = arith.constant dense<0.000000e+00> : vector<8x128xf32>
    %25 = tpu.matmul %23, %24, %cst_17 {dimension_numbers = #tpu.dot_dimension_numbers<[1], [0], [0], [1], [0, 0, 1, 1], [], []>} : vector<8x128xf32>, vector<128x128xf32>, vector<8x128xf32> -> vector<8x128xf32>
    %26 = arith.addf %16, %25 : vector<8x128xf32>
    %cst_18 = arith.constant 0.000000e+00 : f32
    %27 = vector.broadcast %cst_18 : f32 to vector<8x128xf32>
    %28 = arith.maximumf %26, %27 : vector<8x128xf32>
    %c424 = arith.constant 424 : index
    %c0_19 = arith.constant 0 : index
    %29 = vector.load %arg2[%c424, %c0_19] : memref<576x128xf32, #tpu.memory_space<vmem>>, vector<128x128xf32>
    %cst_20 = arith.constant dense<0.000000e+00> : vector<8x128xf32>
    %30 = tpu.matmul %28, %29, %cst_20 {dimension_numbers = #tpu.dot_dimension_numbers<[1], [0], [0], [1], [0, 0, 1, 1], [], []>} : vector<8x128xf32>, vector<128x128xf32>, vector<8x128xf32> -> vector<8x128xf32>
    %c552 = arith.constant 552 : index
    %c0_21 = arith.constant 0 : index
    %31 = vector.load %arg2[%c552, %c0_21] : memref<576x128xf32, #tpu.memory_space<vmem>>, vector<1x128xf32>
    %32 = vector.broadcast %31 : vector<1x128xf32> to vector<8x128xf32>
    %33 = arith.addf %30, %32 : vector<8x128xf32>
    %c560 = arith.constant 560 : index
    %c0_22 = arith.constant 0 : index
    %34 = vector.load %arg2[%c560, %c0_22] : memref<576x128xf32, #tpu.memory_space<vmem>>, vector<1x128xf32>
    %c568 = arith.constant 568 : index
    %c0_23 = arith.constant 0 : index
    %35 = vector.load %arg2[%c568, %c0_23] : memref<576x128xf32, #tpu.memory_space<vmem>>, vector<1x128xf32>
    %36 = vector.broadcast %34 : vector<1x128xf32> to vector<8x128xf32>
    %37 = arith.subf %36, %33 : vector<8x128xf32>
    %cst_24 = arith.constant 0.000000e+00 : f32
    %38 = vector.broadcast %cst_24 : f32 to vector<8x128xf32>
    %39 = arith.maximumf %37, %38 : vector<8x128xf32>
    %40 = math.absf %37 : vector<8x128xf32>
    %cst_25 = arith.constant 0.000000e+00 : f32
    %41 = vector.broadcast %cst_25 : f32 to vector<8x128xf32>
    %42 = arith.subf %41, %40 : vector<8x128xf32>
    %43 = math.exp %42 : vector<8x128xf32>
    %cst_26 = arith.constant 1.000000e+00 : f32
    %44 = vector.broadcast %cst_26 : f32 to vector<8x128xf32>
    %45 = arith.addf %44, %43 : vector<8x128xf32>
    %46 = math.log %45 : vector<8x128xf32>
    %47 = arith.addf %39, %46 : vector<8x128xf32>
    %48 = vector.broadcast %34 : vector<1x128xf32> to vector<8x128xf32>
    %49 = arith.subf %48, %47 : vector<8x128xf32>
    %50 = vector.broadcast %35 : vector<1x128xf32> to vector<8x128xf32>
    %51 = arith.subf %49, %50 : vector<8x128xf32>
    %cst_27 = arith.constant 0.000000e+00 : f32
    %52 = vector.broadcast %cst_27 : f32 to vector<8x128xf32>
    %53 = arith.maximumf %51, %52 : vector<8x128xf32>
    %54 = math.absf %51 : vector<8x128xf32>
    %cst_28 = arith.constant 0.000000e+00 : f32
    %55 = vector.broadcast %cst_28 : f32 to vector<8x128xf32>
    %56 = arith.subf %55, %54 : vector<8x128xf32>
    %57 = math.exp %56 : vector<8x128xf32>
    %cst_29 = arith.constant 1.000000e+00 : f32
    %58 = vector.broadcast %cst_29 : f32 to vector<8x128xf32>
    %59 = arith.addf %58, %57 : vector<8x128xf32>
    %60 = math.log %59 : vector<8x128xf32>
    %61 = arith.addf %53, %60 : vector<8x128xf32>
    %62 = vector.broadcast %35 : vector<1x128xf32> to vector<8x128xf32>
    %63 = arith.addf %62, %61 : vector<8x128xf32>
    %64 = tpu.iota {dimensions = array<i32: 1>} : vector<8x128xi32>
    %c6_i32 = arith.constant 6 : i32
    %65 = vector.broadcast %c6_i32 : i32 to vector<8x128xi32>
    %66 = arith.cmpi sge, %64, %65 : vector<8x128xi32>
    %67 = arith.select %66, %63, %33 : vector<8x128xi1>, vector<8x128xf32>
    %68 = vector.extract_strided_slice %67 {offsets = [0, 0], sizes = [8, 12], strides = [1, 1]} : vector<8x128xf32> to vector<8x12xf32>
    %c0_30 = arith.constant 0 : index
    %c0_31 = arith.constant 0 : index
    %69 = vector.load %arg5[%c0_30, %c0_31] : memref<8x12xf32, #tpu.memory_space<vmem>>, vector<8x12xf32>
    tpu.vector_store %arg5[%c0_30, %c0_31], %68 {strides = array<i32>} : memref<8x12xf32, #tpu.memory_space<vmem>>, vector<8x12xf32>,
    %c0_32 = arith.constant 0 : index
    %c0_33 = arith.constant 0 : index
    %70 = vector.load %arg3[%c0_32, %c0_33] : memref<8x12xf32, #tpu.memory_space<vmem>>, vector<8x12xf32>
    %71 = arith.subf %68, %70 : vector<8x12xf32>
    %72 = arith.mulf %71, %71 : vector<8x12xf32>
    %cst_34 = arith.constant dense<0.000000e+00> : vector<8xf32>
    %73 = vector.multi_reduction <add>, %72, %cst_34 [1] : vector<8x12xf32> to vector<8xf32>
    %74 = vector.shape_cast %73 : vector<8xf32> to vector<8x1xf32>
    %cst_35 = arith.constant dense<0.000000e+00> : vector<1xf32>
    %75 = vector.multi_reduction <add>, %74, %cst_35 [0] : vector<8x1xf32> to vector<1xf32>
    %76 = vector.shape_cast %75 : vector<1xf32> to vector<1x1xf32>
    %cst_36 = arith.constant 1.200000e+01 : f32
    %77 = vector.broadcast %cst_36 : f32 to vector<1x1xf32>
    %78 = arith.divf %76, %77 : vector<1x1xf32>
    %cst_37 = arith.constant 0.000000e+00 : f32
    %79 = vector.broadcast %cst_37 : f32 to vector<1x1xf32>
    %80 = arith.subf %79, %78 : vector<1x1xf32>
    %c0_38 = arith.constant 0 : index
    %c0_39 = arith.constant 0 : index
    %81 = vector.load %arg4[%c0_38, %c0_39] : memref<48x128xf32, #tpu.memory_space<vmem>>, vector<48x128xf32>
    %82 = math.absf %81 : vector<48x128xf32>
    %cst_40 = arith.constant dense<0.000000e+00> : vector<48xf32>
    %83 = vector.multi_reduction <add>, %82, %cst_40 [1] : vector<48x128xf32> to vector<48xf32>
    %84 = vector.shape_cast %83 : vector<48xf32> to vector<48x1xf32>
    %cst_41 = arith.constant dense<0.000000e+00> : vector<1xf32>
    %85 = vector.multi_reduction <add>, %84, %cst_41 [0] : vector<48x1xf32> to vector<1xf32>
    %86 = vector.shape_cast %85 : vector<1xf32> to vector<1x1xf32>
    %cst_42 = arith.constant 0.00999999977 : f32
    %87 = vector.broadcast %cst_42 : f32 to vector<1x1xf32>
    %88 = arith.mulf %87, %86 : vector<1x1xf32>
    %89 = arith.subf %80, %88 : vector<1x1xf32>
    %c0_43 = arith.constant 0 : index
    %c0_44 = arith.constant 0 : index
    %90 = vector.load %arg6[%c0_43, %c0_44] : memref<1x1xf32, #tpu.memory_space<vmem>>, vector<1x1xf32>
    tpu.vector_store %arg6[%c0_43, %c0_44], %89 {strides = array<i32>} : memref<1x1xf32, #tpu.memory_space<vmem>>, vector<1x1xf32>,
    return
  }
}

</mosaic_0001>

<bundles_post_ra>
// kernel: tpu_custom_call.1
= control target key start
LH: loop header
LB: loop body
LE: loop exit
PB: predicated region body
PF: predicated region fallthrough
CT: control target
= control target key end

     0   :  { %12 = vsyncpa [#allocation3], 0  ;;  %s1294_s0 = inlined_call_operand.vmem [shape: f32[8,6], index: 0, kind: input, shape index: {}]   ;;  %s1295_s1 = inlined_call_operand.vmem [shape: f32[8,2], index: 1, kind: input, shape index: {}]   ;;  %s1296_s2 = inlined_call_operand.hbm [shape: f32[576,128], index: 2, kind: input, shape index: {}]   ;;  %s1297_s3 = inlined_call_operand.vmem [shape: f32[8,12], index: 3, kind: input, shape index: {}]   ;;  %s1298_s4 = inlined_call_operand.hbm [shape: f32[48,128], index: 4, kind: input, shape index: {}]   ;;  %s1299_s5 = inlined_call_operand.hbm [shape: f32[8,12], index: 5, kind: output, shape index: {0}]   ;;  %s1300_s6 = inlined_call_operand.hbm [shape: f32[1,1], index: 6, kind: output, shape index: {1}]  }
   0x1   :  { %13 = vsyncpa [#allocation6], 0 }
   0x2   :  { %14 = vsyncpa [#allocation4], 0 }
   0x3   :  { %15 = vsyncpa [#allocation9], 0  ;;  %s1147_s21 = smov [#allocation2]   ;;  %s1051_s25 = scalar_lea.hbm %s1296_s2, 9216 }
   0x4   :  { %s25_s22 = sshll.u32 %s1147_s21, 4  ;;  %p1052_p0 = scmp.ne.s32.totalorder %s1296_s2, %s1051_s25  ;;  %s26_s22 = int_to_ptr.vmem [resolvable:$true] %s25_s22 }
   0x5   :  { %p1055_p1 = scmp.lt.u32.totalorder %s1051_s25, %s1296_s2 }
   0x7   :  { %p1057_p2 = pnand %p1055_p1, %p1052_p0 }
   0x9   :  { %1060 = shalt.err (!%p1057_p2)
}
   0xa   :  { %s1061_s30 = scalar_lea.vmem %s26_s22, 9216  ;;  %p1066_p4 = scmp.lt.s32.totalorder %s26_s22, %s26_s22 }
   0xb   :  { %p1062_p3 = scmp.ne.s32.totalorder %s26_s22, %s1061_s30  ;;  %p1067_p5 = scmp.lt.s32.totalorder %s1061_s30, %s1061_s30 }
   0xd   :  { %p1068_p6 = por %p1067_p5, %p1066_p4 }
   0xf   :  { %p1069_p7 = pnand %p1068_p6, %p1062_p3 }
  0x11   :  { %1072 = shalt.err (!%p1069_p7)
}
  0x12   :  { %s1148_s7 = smov 128   ;;  %s1149_s8 = smov 8  }
  0x13   :  { %31 = dma.hbm_to_vmem [thread:$0]  %s1296_s2, 9216, %s26_s22, [#allocation3], %s1148_s7, %s1148_s7, %s1149_s8  }
  0x14   :  { %s1150_s11 = smov [#allocation5]   ;;  %s1073_s15 = scalar_lea.hbm %s1298_s4, 768 }
  0x15   :  { %s39_s12 = sshll.u32 %s1150_s11, 4  ;;  %p1074_p8 = scmp.ne.s32.totalorder %s1298_s4, %s1073_s15  ;;  %s40_s12 = int_to_ptr.vmem [resolvable:$true] %s39_s12 }
  0x16   :  { %p1077_p9 = scmp.lt.u32.totalorder %s1073_s15, %s1298_s4 }
  0x18   :  { %p1079_p10 = pnand %p1077_p9, %p1074_p8 }
  0x1a   :  { %1082 = shalt.err (!%p1079_p10)
}
  0x1b   :  { %s1083_s20 = scalar_lea.vmem %s40_s12, 768  ;;  %p1088_p12 = scmp.lt.s32.totalorder %s40_s12, %s40_s12 }
  0x1c   :  { %p1084_p11 = scmp.ne.s32.totalorder %s40_s12, %s1083_s20  ;;  %p1089_p13 = scmp.lt.s32.totalorder %s1083_s20, %s1083_s20 }
  0x1e   :  { %p1090_p0 = por %p1089_p13, %p1088_p12 }
  0x20   :  { %p1091_p1 = pnand %p1090_p0, %p1084_p11 }
  0x22   :  { %1094 = shalt.err (!%p1091_p1)
}
  0x23   :  { %45 = dma.hbm_to_vmem [thread:$0]  %s1298_s4, 768, %s40_s12, [#allocation6], %s1148_s7, %s1148_s7, %s1149_s8  }
  0x24   :  { %1139 = dma.done.wait [#allocation3], 9216  }
  0x25   :  { %1140 = vsyncadd [#allocation3], 4294958080 }
  0x26   :  { %1141 = dma.done.wait [#allocation6], 768  }
  0x27   :  { %1142 = vsyncadd [#allocation6], 4294966528  ;;  %v1151_v0 = vmov 0.0   ;;  %vm1152_vm0 = vmmov 0   ;;  %vm60_vm1 = vcmask 1041408   ;;  %vm138_vm2 = vcmask 1045504  }
  0x28   :  { %785 = vmatprep.subr.mxu0 %v1151_v0  ;;  %790 = vmatprep.subr.mxu1 %v1151_v0  ;;  %vm56_vm3 = vcmask 15360   ;;  %vm134_vm4 = vcmask 48128   ;;  %v53_v1 = vld [vmem:[#allocation2 + $0x8] sm:$0x3]  ;;  %v52_v2 = vld [vmem:[#allocation2] sm:$0x3f] }
  0x29   :  { %787 = vmatprep.mubr.msk.f32.mxu0 %vm1152_vm0, %v1151_v0  ;;  %792 = vmatprep.mubr.msk.f32.mxu1 %vm1152_vm0, %v1151_v0  ;;  %v55_v3 = vld [vmem:[%s1295_s1] sm:$0xff]  ;;  %v219_v5 = vld [vmem:[#allocation2 + $0x18] sm:$0xff]  ;;  %v311_v9 = vld [vmem:[#allocation2 + $0xa8] sm:$0xff]  ;;  %v1153_v11 = vmov 0.0|0.0   ;;  %vm617_vm6 = vcmask 97280   ;;  %s1154_s25 = smov [#allocation7]  }
  0x2a   :  { %786 = vmatpush3.msk.msra.mxu0 %vm60_vm1, %v53_v1  ;;  %791 = vmatpush3.msk.msra.mxu1 %vm138_vm2, %v52_v2  ;;  %v54_v4 = vld [vmem:[%s1294_s0] sm:$0xff]  ;;  %v221_v10 = vld [vmem:[#allocation2 + $0x28] sm:$0xff]  ;;  %v222_v13 = vld [vmem:[#allocation2 + $0x30] sm:$0xff]  ;;  %s679_s26 = sshll.u32 %s1154_s25, 4  ;;  %s680_s26 = int_to_ptr.vmem [resolvable:$true] %s679_s26 }
  0x2b   :  { %v220_v6 = vld [vmem:[#allocation2 + $0x20] sm:$0xff]  ;;  %788 = vmatmul.mubr.msk.f32.vlgmr.msra.gmra.mrb[0].mxu0 %vm56_vm3, %v55_v3  ;;  %793 = vmatmul.mubr.msk.f32.vlgmr.msra.gmra.mrb[0].mxu1 %vm134_vm4, %v54_v4  ;;  %v312_v14 = vld [vmem:[#allocation2 + $0xb0] sm:$0xff]  ;;  %v313_v15 = vld [vmem:[#allocation2 + $0xb8] sm:$0xff]  ;;  %v939_v16 = vpack.c.bf16 %v222_v13, %v221_v10  ;;  %s1095_s27 = scalar_lea.vmem %s680_s26, 128  ;;  %p1100_p3 = scmp.lt.s32.totalorder %s680_s26, %s680_s26 }
  0x2c   :  { %v936_v7 = vpack.c.bf16 %v220_v6, %v219_v5  ;;  %v310_v8 = vld [vmem:[#allocation2 + $0xa0] sm:$0xff]  ;;  %935 = vmatprep.subr.bf16.mxu0 %v1153_v11  ;;  %959 = vmatprep.subr.bf16.mxu1 %v1153_v11  ;;  %v963_v17 = vpack.c.bf16 %v313_v15, %v312_v14  ;;  %v223_v18 = vld [vmem:[#allocation2 + $0x38] sm:$0xff]  ;;  %v315_v21 = vld [vmem:[#allocation2 + $0xc8] sm:$0xff]  ;;  %p1096_p2 = scmp.ne.s32.totalorder %s680_s26, %s1095_s27  ;;  %p1101_p4 = scmp.lt.s32.totalorder %s1095_s27, %s1095_s27 }
  0x2d   :  { %v960_v12 = vpack.c.bf16 %v311_v9, %v310_v8  ;;  %827 = vmatprep.mubr.msk.f32.mxu0 %vm1152_vm0, %v1151_v0  ;;  %v224_v19 = vld [vmem:[#allocation2 + $0x40] sm:$0xff]  ;;  %862 = vmatprep.mubr.msk.f32.mxu1 %vm1152_vm0, %v1151_v0  ;;  %v225_v24 = vld [vmem:[#allocation2 + $0x48] sm:$0xff]  ;;  %v226_v25 = vld [vmem:[#allocation2 + $0x50] sm:$0xff] }
  0x2e   :  { %937 = vmatpush3.bf16.msra.mxu0 %v936_v7  ;;  %v314_v20 = vld [vmem:[#allocation2 + $0xc0] sm:$0xff]  ;;  %v942_v22 = vpack.c.bf16 %v224_v19, %v223_v18  ;;  %v316_v26 = vld [vmem:[#allocation2 + $0xd0] sm:$0xff]  ;;  %v317_v27 = vld [vmem:[#allocation2 + $0xd8] sm:$0xff]  ;;  %v945_v28 = vpack.c.bf16 %v226_v25, %v225_v24  ;;  %p1102_p5 = por %p1101_p4, %p1100_p3 }
  0x2f   :  { %961 = vmatpush3.bf16.msra.mxu1 %v960_v12  ;;  %938 = vmatprep.subr.bf16.mxu0 %v1153_v11  ;;  %v966_v23 = vpack.c.bf16 %v315_v21, %v314_v20  ;;  %v969_v29 = vpack.c.bf16 %v317_v27, %v316_v26  ;;  %v227_v30 = vld [vmem:[#allocation2 + $0x58] sm:$0xff]  ;;  %v228_v31 = vld [vmem:[#allocation2 + $0x60] sm:$0xff]  ;;  %v319_v33 = vld [vmem:[#allocation2 + $0xe8] sm:$0xff] }
  0x30   :  { %962 = vmatprep.subr.bf16.mxu1 %v1153_v11  ;;  %v318_v32 = vld [vmem:[#allocation2 + $0xe0] sm:$0xff]  ;;  %v948_v34 = vpack.c.bf16 %v228_v31, %v227_v30  ;;  %v229_v36 = vld [vmem:[#allocation2 + $0x68] sm:$0xff]  ;;  %v230_v37 = vld [vmem:[#allocation2 + $0x70] sm:$0xff]  ;;  %p1103_p6 = pnand %p1102_p5, %p1096_p2 }
  0x31   :  { %v972_v35 = vpack.c.bf16 %v319_v33, %v318_v32  ;;  %v320_v38 = vld [vmem:[#allocation2 + $0xf0] sm:$0xff]  ;;  %v321_v39 = vld [vmem:[#allocation2 + $0xf8] sm:$0xff]  ;;  %v951_v40 = vpack.c.bf16 %v230_v37, %v229_v36  ;;  %v232_v43 = vld [vmem:[#allocation2 + $0x80] sm:$0xff] }
  0x32   :  { %940 = vmatpush3.bf16.msra.mxu0 %v939_v16  ;;  %v975_v41 = vpack.c.bf16 %v321_v39, %v320_v38  ;;  %v231_v42 = vld [vmem:[#allocation2 + $0x78] sm:$0xff]  ;;  %v322_v44 = vld [vmem:[#allocation2 + $0x100] sm:$0xff]  ;;  %v323_v46 = vld [vmem:[#allocation2 + $0x108] sm:$0xff] }
  0x33   :  { %964 = vmatpush3.bf16.msra.mxu1 %v963_v17  ;;  %941 = vmatprep.subr.bf16.mxu0 %v1153_v11  ;;  %v954_v45 = vpack.c.bf16 %v232_v43, %v231_v42  ;;  %v978_v47 = vpack.c.bf16 %v323_v46, %v322_v44  ;;  %v233_v48 = vld [vmem:[#allocation2 + $0x88] sm:$0xff]  ;;  %v234_v49 = vld [vmem:[#allocation2 + $0x90] sm:$0xff]  ;;  %v325_v52 = vld [vmem:[#allocation2 + $0x118] sm:$0xff] }
  0x34   :  { %965 = vmatprep.subr.bf16.mxu1 %v1153_v11  ;;  %v957_v50 = vpack.c.bf16 %v234_v49, %v233_v48  ;;  %v324_v51 = vld [vmem:[#allocation2 + $0x110] sm:$0xff]  ;;  %v402_v60 = vld [vmem:[#allocation2 + $0x128] sm:$0xff]  ;;  %v404_v2 = vld [vmem:[#allocation2 + $0x138] sm:$0xff] }
  0x35   :  { %v981_v53 = vpack.c.bf16 %v325_v52, %v324_v51  ;;  %v707_v56 = vld [vmem:[#allocation2 + $0x10] ss:$0 sm:$0xff]  ;;  %v405_v3 = vld [vmem:[#allocation2 + $0x140] sm:$0xff]  ;;  %v406_v5 = vld [vmem:[#allocation2 + $0x148] sm:$0xff] }
  0x36   :  { %943 = vmatpush3.bf16.msra.mxu0 %v942_v22  ;;  %v403_v61 = vld [vmem:[#allocation2 + $0x130] sm:$0xff]  ;;  %v987_v4 = vpack.c.bf16 %v405_v3, %v404_v2  ;;  %v408_v8 = vld [vmem:[#allocation2 + $0x158] sm:$0xff]  ;;  %v409_v9 = vld [vmem:[#allocation2 + $0x160] sm:$0xff] }
  0x37   :  { %967 = vmatpush3.bf16.msra.mxu1 %v966_v23  ;;  %944 = vmatprep.subr.bf16.mxu0 %v1153_v11  ;;  %v984_v63 = vpack.c.bf16 %v403_v61, %v402_v60  ;;  %v407_v6 = vld [vmem:[#allocation2 + $0x150] sm:$0xff]  ;;  %v993_v10 = vpack.c.bf16 %v409_v9, %v408_v8  ;;  %v410_v12 = vld [vmem:[#allocation2 + $0x168] sm:$0xff]  ;;  %v412_v15 = vld [vmem:[#allocation2 + $0x178] sm:$0xff] }
  0x38   :  { %968 = vmatprep.subr.bf16.mxu1 %v1153_v11  ;;  %v990_v7 = vpack.c.bf16 %v407_v6, %v406_v5  ;;  %v411_v13 = vld [vmem:[#allocation2 + $0x170] sm:$0xff]  ;;  %v413_v16 = vld [vmem:[#allocation2 + $0x180] sm:$0xff]  ;;  %v414_v17 = vld [vmem:[#allocation2 + $0x188] sm:$0xff] }
  0x39   :  { %v996_v14 = vpack.c.bf16 %v411_v13, %v410_v12  ;;  %v415_v18 = vld [vmem:[#allocation2 + $0x190] sm:$0xff]  ;;  %v416_v20 = vld [vmem:[#allocation2 + $0x198] sm:$0xff]  ;;  %v417_v21 = vld [vmem:[#allocation2 + $0x1a0] sm:$0xff] }
  0x3a   :  { %946 = vmatpush3.bf16.msra.mxu0 %v945_v28  ;;  %v1002_v19 = vpack.c.bf16 %v415_v18, %v414_v17  ;;  %v1005_v22 = vpack.c.bf16 %v417_v21, %v416_v20  ;;  %v490_v23 = vld [vmem:[#allocation2 + $0x1a8] sm:$0xff]  ;;  %v491_v24 = vld [vmem:[#allocation2 + $0x1b0] sm:$0xff]  ;;  %v492_v25 = vld [vmem:[#allocation2 + $0x1b8] sm:$0xff] }
  0x3b   :  { %970 = vmatpush3.bf16.msra.mxu1 %v969_v29  ;;  %947 = vmatprep.subr.bf16.mxu0 %v1153_v11  ;;  %v1008_v26 = vpack.c.bf16 %v491_v24, %v490_v23  ;;  %v493_v27 = vld [vmem:[#allocation2 + $0x1c0] sm:$0xff]  ;;  %v494_v29 = vld [vmem:[#allocation2 + $0x1c8] sm:$0xff]  ;;  %v495_v30 = vld [vmem:[#allocation2 + $0x1d0] sm:$0xff] }
  0x3c   :  { %971 = vmatprep.subr.bf16.mxu1 %v1153_v11  ;;  %v1011_v28 = vpack.c.bf16 %v493_v27, %v492_v25  ;;  %v1014_v31 = vpack.c.bf16 %v495_v30, %v494_v29  ;;  %v496_v32 = vld [vmem:[#allocation2 + $0x1d8] sm:$0xff]  ;;  %v497_v33 = vld [vmem:[#allocation2 + $0x1e0] sm:$0xff]  ;;  %v499_v36 = vld [vmem:[#allocation2 + $0x1f0] sm:$0xff] }
  0x3d   :  { %v500_v38 = vld [vmem:[#allocation2 + $0x1f8] sm:$0xff]  ;;  %v501_v39 = vld [vmem:[#allocation2 + $0x200] sm:$0xff]  ;;  %v503_v42 = vld [vmem:[#allocation2 + $0x210] sm:$0xff] }
  0x3e   :  { %949 = vmatpush3.bf16.msra.mxu0 %v948_v34  ;;  %v1017_v34 = vpack.c.bf16 %v497_v33, %v496_v32  ;;  %v709_v44 = vld [vmem:[#allocation2 + $0x120] ss:$0 sm:$0xff]  ;;  %v504_v49 = vld [vmem:[#allocation2 + $0x218] sm:$0xff]  ;;  %v639_v3 = vld [vmem:[#allocation5 + $0x28] sm:$0xff] }
  0x3f   :  { %973 = vmatpush3.bf16.msra.mxu1 %v972_v35  ;;  %950 = vmatprep.subr.bf16.mxu0 %v1153_v11  ;;  %v498_v35 = vld [vmem:[#allocation2 + $0x1e8] sm:$0xff]  ;;  %v708_v52 = vld [vmem:[#allocation2 + $0x98] ss:$0 sm:$0xff] }
  0x40   :  { %974 = vmatprep.subr.bf16.mxu1 %v1153_v11  ;;  %v1020_v37 = vpack.c.bf16 %v499_v36, %v498_v35  ;;  %v637_v60 = vld [vmem:[#allocation5 + $0x18] sm:$0xff]  ;;  %v710_v5 = vld [vmem:[#allocation2 + $0x228] ss:$0 sm:$0xff]  ;;  %v619_v35 = vld [vmem:[%s1297_s3] sm:$0xff] }
  0x41   :  { %v712_v20 = vld [vmem:[#allocation2 + $0x238] ss:$0 sm:$0xff] }
  0x42   :  { %952 = vmatpush3.bf16.msra.mxu0 %v951_v40  ;;  %v1023_v40 = vpack.c.bf16 %v501_v39, %v500_v38 }
  0x43   :  { %976 = vmatpush3.bf16.msra.mxu1 %v975_v41  ;;  %953 = vmatprep.subr.bf16.mxu0 %v1153_v11  ;;  %v502_v41 = vld [vmem:[#allocation2 + $0x208] sm:$0xff] }
  0x44   :  { %977 = vmatprep.subr.bf16.mxu1 %v1153_v11  ;;  %v1026_v43 = vpack.c.bf16 %v503_v42, %v502_v41 }
  0x46   :  { %955 = vmatpush3.bf16.msra.mxu0 %v954_v45 }
  0x47   :  { %979 = vmatpush3.bf16.msra.mxu1 %v978_v47  ;;  %956 = vmatprep.subr.bf16.mxu0 %v1153_v11 }
  0x48   :  { %980 = vmatprep.subr.bf16.mxu1 %v1153_v11 }
  0x4a   :  { %958 = vmatpush3.bf16.msra.mxu0 %v957_v50  ;;  %v505_v50 = vld [vmem:[#allocation2 + $0x220] sm:$0xff] }
  0x4b   :  { %982 = vmatpush3.bf16.msra.mxu1 %v981_v53  ;;  %983 = vmatprep.subr.bf16.mxu0 %v1153_v11  ;;  %v1029_v51 = vpack.c.bf16 %v505_v50, %v504_v49 }
  0x4c   :  { %1007 = vmatprep.subr.bf16.mxu1 %v1153_v11 }
  0xfe   :  { %v130_v54 = vpop.f32.mrb[0].mxu0  ;;  %v208_v55 = vpop.f32.mrb[0].mxu1 }
  0xff   :  { %v209_v57 = vadd.f32 %v208_v55, %v130_v54  ;;  %v789_v58 = vpop.f32.mrb[1].mxu0  ;;  %v794_v59 = vpop.f32.mrb[1].mxu1 }
 0x100   :  { %v636_v59 = vld [vmem:[#allocation5 + $0x10] sm:$0xff] }
 0x101   :  { %v217_v62 = vadd.f32 %v707_v56, %v209_v57  ;;  %v634_v57 = vld [vmem:[#allocation5] sm:$0xff]  ;;  %v642_v61 = vand.u32 2147483647, %v636_v59 }
 0x102   :  { %v640_v58 = vand.u32 2147483647, %v634_v57 }
 0x103   :  { %v218_v1 = vmax.f32 %v217_v62, 0.0  ;;  %650 = vadd.xlane.f32.xlu1 %v642_v61 }
 0x104   :  { %646 = vadd.xlane.f32.xlu0 %v640_v58 }
 0x105   :  { %828 = vmatmul.mubr.f32.vlgmr.msra.gmra.mrb[2].mxu0 %v218_v1  ;;  %863 = vmatmul.mubr.f32.vlgmr.msra.gmra.mrb[2].mxu1 %v218_v1  ;;  %v643_v1 = vand.u32 2147483647, %v637_v60 }
 0x106   :  { %985 = vmatpush3.bf16.msra.mxu0 %v984_v63  ;;  %897 = vmatprep.mubr.msk.f32.mxu0 %vm1152_vm0, %v1151_v0  ;;  %v638_v63 = vld [vmem:[#allocation5 + $0x20] sm:$0xff] }
 0x107   :  { %986 = vmatprep.subr.bf16.mxu0 %v1153_v11  ;;  %932 = vmatprep.mubr.msk.f32.mxu1 %vm1152_vm0, %v1151_v0  ;;  %v999_v0 = vpack.c.bf16 %v413_v16, %v412_v15  ;;  %v644_v2 = vand.u32 2147483647, %v638_v63 }
 0x108   :  { %1009 = vmatpush3.bf16.msra.mxu1 %v1008_v26  ;;  %652 = vadd.xlane.f32.xlu1 %v643_v1 }
 0x109   :  { %1010 = vmatprep.subr.bf16.mxu1 %v1153_v11 }
 0x10a   :  { %988 = vmatpush3.bf16.msra.mxu0 %v987_v4  ;;  %v645_v4 = vand.u32 2147483647, %v639_v3 }
 0x10b   :  { %989 = vmatprep.subr.bf16.mxu0 %v1153_v11 }
 0x10c   :  { %1012 = vmatpush3.bf16.msra.mxu1 %v1011_v28  ;;  %v613_v28 = vlaneseq }
 0x10d   :  { %1013 = vmatprep.subr.bf16.mxu1 %v1153_v11 }
 0x10e   :  { %991 = vmatpush3.bf16.msra.mxu0 %v990_v7  ;;  %v711_v7 = vld [vmem:[#allocation2 + $0x230] ss:$0 sm:$0xff]  ;;  %v614_v30 = vand.u32 127, %v613_v28 }
 0x10f   :  { %992 = vmatprep.subr.bf16.mxu0 %v1153_v11 }
 0x110   :  { %1015 = vmatpush3.bf16.msra.mxu1 %v1014_v31  ;;  %vm615_vm5 = vcmp.ge.s32.totalorder %v614_v30, 6 }
 0x111   :  { %1016 = vmatprep.subr.bf16.mxu1 %v1153_v11 }
 0x112   :  { %994 = vmatpush3.bf16.msra.mxu0 %v993_v10 }
 0x113   :  { %995 = vmatprep.subr.bf16.mxu0 %v1153_v11 }
 0x114   :  { %1018 = vmatpush3.bf16.msra.mxu1 %v1017_v34 }
 0x115   :  { %1019 = vmatprep.subr.bf16.mxu1 %v1153_v11 }
 0x116   :  { %997 = vmatpush3.bf16.msra.mxu0 %v996_v14 }
 0x117   :  { %998 = vmatprep.subr.bf16.mxu0 %v1153_v11 }
 0x118   :  { %1021 = vmatpush3.bf16.msra.mxu1 %v1020_v37 }
 0x119   :  { %1022 = vmatprep.subr.bf16.mxu1 %v1153_v11 }
 0x11a   :  { %1000 = vmatpush3.bf16.msra.mxu0 %v999_v0 }
 0x11b   :  { %1001 = vmatprep.subr.bf16.mxu0 %v1153_v11 }
 0x11c   :  { %1024 = vmatpush3.bf16.msra.mxu1 %v1023_v40 }
 0x11d   :  { %1025 = vmatprep.subr.bf16.mxu1 %v1153_v11 }
 0x11e   :  { %1003 = vmatpush3.bf16.msra.mxu0 %v1002_v19 }
 0x11f   :  { %1004 = vmatprep.subr.bf16.mxu0 %v1153_v11 }
 0x120   :  { %1027 = vmatpush3.bf16.msra.mxu1 %v1026_v43 }
 0x121   :  { %1028 = vmatprep.subr.bf16.mxu1 %v1153_v11  ;;  %v635_v11 = vld [vmem:[#allocation5 + $0x8] sm:$0xff] }
 0x122   :  { %1006 = vmatpush3.bf16.msra.mxu0 %v1005_v22  ;;  %v641_v62 = vand.u32 2147483647, %v635_v11 }
 0x124   :  { %1030 = vmatpush3.bf16.msra.mxu1 %v1029_v51  ;;  %648 = vadd.xlane.f32.xlu0 %v641_v62 }
 0x128   :  { %654 = vadd.xlane.f32.xlu0 %v644_v2 }
 0x12c   :  { %656 = vadd.xlane.f32.xlu0 %v645_v4 }
 0x1d8   :  { %v397_v45 = vpop.f32.mrb[2].mxu1 }
 0x1d9   :  { %v398_v46 = vadd.f32 %v709_v44, %v397_v45  ;;  %v864_v47 = vpop.f32.mrb[3].mxu1 }
 0x1db   :  { %v401_v48 = vmax.f32 %v398_v46, 0.0 }
 0x1dd   :  { %898 = vmatmul.mubr.f32.vlgmr.msra.gmra.mrb[2].mxu0 %v401_v48 }
 0x2b0   :  { %v484_v53 = vpop.f32.mrb[2].mxu0 }
 0x2b1   :  { %v1031_v54 = vadd.f32 %v708_v52, %v484_v53  ;;  %v899_v55 = vpop.f32.mrb[3].mxu0 }
 0x2b3   :  { %v489_v56 = vmax.f32 %v1031_v54, 0.0 }
 0x2b5   :  { %933 = vmatmul.mubr.f32.vlgmr.msra.gmra.mrb[4].mxu1 %v489_v56 }
 0x388   :  { %v577_v6 = vpop.f32.mrb[4].mxu1 }
 0x389   :  { %v578_v8 = vadd.f32 %v710_v5, %v577_v6  ;;  %v934_v9 = vpop.f32.mrb[5].mxu1 }
 0x38b   :  { %v587_v10 = vsub.f32 %v711_v7, %v578_v8 }
 0x38d   :  { %v589_v12 = vand.u32 2147483647, %v587_v10  ;;  %v588_v17 = vmax.f32 %v587_v10, 0.0 }
 0x38f   :  { %v590_v13 = vsub.f32 0.0, %v589_v12 }
 0x391   :  { %v591_v14 = vmul.f32 1.442695, %v590_v13 }
 0x393   :  { %1043 = vpow2.f32 %v591_v14 }
 0x39d   :  { %v1044_v15 = vpop.eup %1043 }
 0x39e   :  { %v593_v16 = vadd.f32 1.0, %v1044_v15 }
 0x3a0   :  { %1045 = vlog2.f32 %v593_v16 }
 0x3aa   :  { %v1046_v0 = vpop.eup %1045 }
 0x3ab   :  { %v595_v18 = vmul.f32 0.6931472, %v1046_v0 }
 0x3ad   :  { %v596_v19 = vadd.f32 %v595_v18, %v588_v17 }
 0x3af   :  { %v597_v21 = vsub.f32 %v711_v7, %v596_v19 }
 0x3b1   :  { %v602_v22 = vsub.f32 %v597_v21, %v712_v20 }
 0x3b3   :  { %v604_v23 = vand.u32 2147483647, %v602_v22  ;;  %v603_v31 = vmax.f32 %v602_v22, 0.0 }
 0x3b5   :  { %v605_v24 = vsub.f32 0.0, %v604_v23 }
 0x3b7   :  { %v606_v25 = vmul.f32 1.442695, %v605_v24 }
 0x3b9   :  { %1047 = vpow2.f32 %v606_v25 }
 0x3c3   :  { %v1048_v26 = vpop.eup %1047 }
 0x3c4   :  { %v608_v27 = vadd.f32 1.0, %v1048_v26 }
 0x3c6   :  { %1049 = vlog2.f32 %v608_v27 }
 0x3d0   :  { %v1050_v29 = vpop.eup %1049 }
 0x3d1   :  { %v610_v32 = vmul.f32 0.6931472, %v1050_v29 }
 0x3d3   :  { %v611_v33 = vadd.f32 %v610_v32, %v603_v31 }
 0x3d5   :  { %v612_v34 = vadd.f32 %v712_v20, %v611_v33 }
 0x3d7   :  { %v616_v36 = vsel %vm615_vm5, %v612_v34, %v578_v8 }
 0x3d8   :  { %v620_v37 = vsub.f32 %v616_v36, %v619_v35  ;;  %618 = vst.msk [vmem:[#allocation7] sm:$0xff] %vm617_vm6, %v616_v36 }
 0x3da   :  { %v621_v38 = vmul.f32 %v620_v37, %v620_v37 }
 0x3dc   :  { %v622_v39 = vsel %vm617_vm6, %v621_v38, 0.0 }
 0x3dd   :  { %623 = vadd.xlane.f32.xlu1 %v622_v39 }
 0x3de   :  { %1106 = shalt.err (!%p1103_p6)
}
 0x3df   :  { %s1107_s3 = scalar_lea.hbm %s1299_s5, 128 }
 0x3e0   :  { %p1108_p7 = scmp.ne.s32.totalorder %s1299_s5, %s1107_s3  ;;  %p1111_p8 = scmp.lt.u32.totalorder %s1107_s3, %s1299_s5 }
 0x3e2   :  { %p1113_p9 = pnand %p1111_p8, %p1108_p7 }
 0x3e4   :  { %1116 = shalt.err (!%p1113_p9)
}
 0x3e5   :  { %682 = dma.vmem_to_hbm [thread:$0]  %s680_s26, 128, %s1299_s5, [#allocation4]   ;;  %v647_v40 = vpop.xlane.xlu0 %646  ;;  %v651_v42 = vpop.xlane.xlu1 %650  ;;  %vm671_vm7 = vcmask 0  }
 0x3e6   :  { %s1155_s5 = smov [#allocation8]  }
 0x3e7   :  { %s689_s12 = sshll.u32 %s1155_s5, 4  ;;  %s690_s12 = int_to_ptr.vmem [resolvable:$true] %s689_s12 }
 0x3e8   :  { %s1117_s13 = scalar_lea.vmem %s690_s12, 16  ;;  %s1121_s14 = scalar_lea.vmem %s690_s12, 32 }
 0x3e9   :  { %v649_v41 = vpop.xlane.xlu0 %648  ;;  %v653_v45 = vpop.xlane.xlu1 %652  ;;  %p1118_p10 = scmp.ne.s32.totalorder %s690_s12, %s1117_s13  ;;  %p1122_p11 = scmp.lt.s32.totalorder %s690_s12, %s690_s12 }
 0x3ea   :  { %v658_v43 = vadd.f32 %v649_v41, %v647_v40  ;;  %p1123_p12 = scmp.lt.s32.totalorder %s1121_s14, %s1117_s13 }
 0x3ec   :  { %v659_v44 = vadd.f32 %v658_v43, %v651_v42  ;;  %p1124_p13 = por %p1123_p12, %p1122_p11 }
 0x3ed   :  { %v655_v46 = vpop.xlane.xlu0 %654 }
 0x3ee   :  { %v660_v47 = vadd.f32 %v659_v44, %v653_v45  ;;  %p1125_p0 = pnand %p1124_p13, %p1118_p10 }
 0x3f0   :  { %v661_v48 = vadd.f32 %v660_v47, %v655_v46 }
 0x3f1   :  { %v657_v49 = vpop.xlane.xlu0 %656 }
 0x3f2   :  { %v662_v50 = vadd.f32 %v661_v48, %v657_v49 }
 0x3f4   :  { %v663_v51 = vrot.slane %v662_v50, 4 }
 0x3f6   :  { %v664_v52 = vadd.f32 %v663_v51, %v662_v50 }
 0x3f8   :  { %v665_v53 = vrot.slane %v664_v52, 2 }
 0x3fa   :  { %v666_v56 = vadd.f32 %v665_v53, %v664_v52 }
 0x3fc   :  { %v667_v59 = vrot.slane %v666_v56, 1 }
 0x3fe   :  { %v668_v61 = vadd.f32 %v667_v59, %v666_v56 }
 0x400   :  { %v669_v1 = vmul.f32 0.01, %v668_v61 }
 0x46a   :  { %v624_v54 = vpop.xlane.xlu1 %623 }
 0x46b   :  { %v625_v55 = vrot.slane %v624_v54, 4 }
 0x46d   :  { %v626_v57 = vadd.f32 %v625_v55, %v624_v54 }
 0x46f   :  { %v627_v58 = vrot.slane %v626_v57, 2 }
 0x471   :  { %v628_v11 = vadd.f32 %v627_v58, %v626_v57 }
 0x473   :  { %v629_v60 = vrot.slane %v628_v11, 1 }
 0x475   :  { %v630_v62 = vadd.f32 %v629_v60, %v628_v11 }
 0x477   :  { %v632_v63 = vmul.f32 0.083333336, %v630_v62 }
 0x479   :  { %v633_v2 = vsub.f32 0.0, %v632_v63 }
 0x47b   :  { %v670_v3 = vsub.f32 %v633_v2, %v669_v1 }
 0x47d   :  { %672 = vst.msk [vmem:[#allocation8] sm:$0x1] %vm671_vm7, %v670_v3 }
 0x47e   :  { %1128 = shalt.err (!%p1125_p0)
}
 0x47f   :  { %s1129_s17 = scalar_lea.hbm %s1300_s6, 16 }
 0x480   :  { %p1130_p1 = scmp.ne.s32.totalorder %s1300_s6, %s1129_s17  ;;  %p1133_p2 = scmp.lt.u32.totalorder %s1129_s17, %s1300_s6 }
 0x482   :  { %p1135_p3 = pnand %p1133_p2, %p1130_p1 }
 0x484   :  { %1138 = shalt.err (!%p1135_p3)
}
 0x485   :  { %692 = dma.vmem_to_hbm [thread:$0]  %s690_s12, 16, %s1300_s6, [#allocation9]  }
 0x486   :  { %1143 = dma.done.wait [#allocation4], 128  }
 0x487   :  { %1144 = vsyncadd [#allocation4], 4294967168 }
 0x488   :  { %1145 = dma.done.wait [#allocation9], 16  }
 0x489   :  { %1146 = vsyncadd [#allocation9], 4294967280 }
 0x48a   :  { %699 = vsyncpa [#allocation3], 1 }
 0x48b   :  { %700 = vsyncpa [#allocation6], 1 }
 0x48c   :  { %701 = vsyncpa [#allocation4], 1 }
 0x48d   :  { %702 = vsyncpa [#allocation9], 1 }

</bundles_post_ra>
